<compile_context>
chip_gen: v6e
topology: v6e:2x2x1
jax: 0.10.0
libtpu: 0.0.40
codegen_flags: <defaults>
</compile_context>

<pallas_src>
import math

import jax
import jax.numpy as jnp
from jax.experimental import pallas as pl
from jax.experimental.pallas import tpu as pltpu

H1 = 32
H2 = 16
OUT = 1


def _critic_kernel(s_ref, a_ref, w1s_ref, w1a_ref, b1_ref,
                   w2_ref, b2_ref, w3_ref, b3_ref, o_ref):
    s = s_ref[...]                      # (TB, state_dim)  f32 or bf16
    a = a_ref[...]                      # (TB, action_dim) f32 or bf16

    # fc1 (split along the concat axis) + relu; accumulate in f32.
    h1 = (jnp.dot(s, w1s_ref[...], preferred_element_type=jnp.float32)
          + jnp.dot(a, w1a_ref[...], preferred_element_type=jnp.float32)
          + b1_ref[...])                # (TB, 32) f32
    h1 = jnp.maximum(h1, 0.0)

    # fc2 + relu (cast activation back to the matmul dtype for the MXU).
    h2 = (jnp.dot(h1.astype(w2_ref.dtype), w2_ref[...],
                  preferred_element_type=jnp.float32)
          + b2_ref[...])                # (TB, 16) f32
    h2 = jnp.maximum(h2, 0.0)

    # value_stream: N=1 matmul -> VPU multiply + cross-lane sum instead of MXU.
    w3 = w3_ref[...].astype(jnp.float32)                    # (1, 16)
    z = jnp.sum(h2 * w3, axis=-1, keepdims=True) + b3_ref[...]  # (TB, 1) f32

    # Numerically stable softplus: max(z, 0) + log1p(exp(-|z|)).
    o_ref[...] = (jnp.maximum(z, 0.0)
                  + jnp.log1p(jnp.exp(-jnp.abs(z)))).astype(o_ref.dtype)


def critic_forward(state, action, params, *,
                   compute_dtype=jnp.float32, tb_max=1024):
    """Pallas forward of the Critic MLP.

    state: (B, state_dim), action: (B, action_dim).
    compute_dtype: dtype of matmul operands (f32 or bf16); epilogue math and
    the output are always f32.
    """
    w1s, w1a, b1, w2, b2, w3_row, b3 = params
    B, state_dim = state.shape
    action_dim = action.shape[1]

    cd = compute_dtype
    state_c = state.astype(cd)
    action_c = action.astype(cd)
    w1s_c = w1s.astype(cd)
    w1a_c = w1a.astype(cd)
    w2_c = w2.astype(cd)
    w3_c = w3_row.astype(cd)
    # Biases stay f32 (epilogue in f32 on every chip generation).

    # Batch tile: either the whole batch (full-dim block) or a multiple of
    # 8 / 128 rows so the (8, 128) block constraint holds.
    tb = B if B <= tb_max else tb_max
    grid = (pl.cdiv(B, tb),)

    def row_spec(shape):
        return pl.BlockSpec(shape, lambda i: (i, 0))

    def const_spec(shape):
        return pl.BlockSpec(shape, lambda i: (0, 0))

    return pl.pallas_call(
        _critic_kernel,
        out_shape=jax.ShapeDtypeStruct((B, OUT), jnp.float32),
        grid=grid,
        in_specs=[
            row_spec((tb, state_dim)),       # state tile
            row_spec((tb, action_dim)),      # action tile
            const_spec((state_dim, H1)),     # W1_s (resident)
            const_spec((action_dim, H1)),    # W1_a (resident)
            const_spec((1, H1)),             # b1
            const_spec((H1, H2)),            # W2
            const_spec((1, H2)),             # b2
            const_spec((1, H2)),             # W3 as a row
            const_spec((1, OUT)),            # b3
        ],
        out_specs=row_spec((tb, OUT)),
        compiler_params=pltpu.CompilerParams(
            dimension_semantics=("parallel",)),
    )(state_c, action_c, w1s_c, w1a_c, b1, w2_c, b2, w3_c, b3)


def init_critic_params(key, state_dim, action_dim):
    """Xavier-uniform weights (as in init_weights_critic), zero biases.

    fc1's weight is initialized as one (input_dim, 32) matrix (same fan-in /
    fan-out as the PyTorch module) and then split into state/action halves.
    """
    input_dim = state_dim + action_dim

    def xavier(k, fan_in, fan_out):
        limit = math.sqrt(6.0 / (fan_in + fan_out))
        return jax.random.uniform(k, (fan_in, fan_out), jnp.float32, -limit, limit)

    k1, k2, k3 = jax.random.split(key, 3)
    w1 = xavier(k1, input_dim, H1)
    w1s, w1a = w1[:state_dim], w1[state_dim:]
    b1 = jnp.zeros((1, H1), jnp.float32)
    w2 = xavier(k2, H1, H2)
    b2 = jnp.zeros((1, H2), jnp.float32)
    w3_row = xavier(k3, H2, OUT).T            # stored as a (1, 16) row
    b3 = jnp.zeros((1, OUT), jnp.float32)
    return (w1s, w1a, b1, w2, b2, w3_row, b3)


def _reference_forward(state, action, params):
    """Plain-JAX reference (mirrors the original torch forward)."""
    w1s, w1a, b1, w2, b2, w3_row, b3 = params
    x = jnp.concatenate([state, action], axis=1)
    w1 = jnp.concatenate([w1s, w1a], axis=0)
    h1 = jnp.maximum(x @ w1 + b1, 0.0)
    h2 = jnp.maximum(h1 @ w2 + b2, 0.0)
    z = h2 @ w3_row.T + b3
    return jnp.maximum(z, 0.0) + jnp.log1p(jnp.exp(-jnp.abs(z)))


if __name__ == "__main__":
    key = jax.random.PRNGKey(0)
    k_params, k_state, k_action = jax.random.split(key, 3)

    batch = 8
    state_dim = 12
    action_dim = 4

    params = init_critic_params(k_params, state_dim, action_dim)
    state = jax.random.normal(k_state, (batch, state_dim), jnp.float32)
    action = jax.random.normal(k_action, (batch, action_dim), jnp.float32)

    q_ref = _reference_forward(state, action, params)

    # 1) f32 path, single block (grid=(1,)).
    q_f32 = jax.block_until_ready(critic_forward(state, action, params))
    assert q_f32.shape == (batch, 1)
    assert jnp.allclose(q_f32, q_ref, atol=1e-5, rtol=1e-5)

    # 2) bf16-operand path (HBM / MXU optimization), looser tolerance.
    q_bf16 = jax.block_until_ready(
        critic_forward(state, action, params, compute_dtype=jnp.bfloat16))
    assert jnp.allclose(q_bf16, q_ref, atol=5e-2, rtol=5e-2)

    # 3) Multi-tile batch grid (exercises pipelining + "parallel" semantics).
    big_b = 2048
    ks, ka = jax.random.split(jax.random.PRNGKey(1))
    big_state = jax.random.normal(ks, (big_b, state_dim), jnp.float32)
    big_action = jax.random.normal(ka, (big_b, action_dim), jnp.float32)
    q_big = jax.block_until_ready(
        critic_forward(big_state, big_action, params, tb_max=512))
    q_big_ref = _reference_forward(big_state, big_action, params)
    assert q_big.shape == (big_b, 1)
    assert jnp.allclose(q_big, q_big_ref, atol=1e-5, rtol=1e-5)

    print("KERNEL_OK")
</pallas_src>

<mosaic_0001>
module attributes {stable_mosaic.version = 11 : i64} {
  func.func @_critic_kernel(%arg0: i32, %arg1: memref<8x12xf32, #tpu.memory_space<vmem>>, %arg2: memref<8x4xf32, #tpu.memory_space<vmem>>, %arg3: memref<12x32xf32, #tpu.memory_space<vmem>>, %arg4: memref<4x32xf32, #tpu.memory_space<vmem>>, %arg5: memref<1x32xf32, #tpu.memory_space<vmem>>, %arg6: memref<32x16xf32, #tpu.memory_space<vmem>>, %arg7: memref<1x16xf32, #tpu.memory_space<vmem>>, %arg8: memref<1x16xf32, #tpu.memory_space<vmem>>, %arg9: memref<1x1xf32, #tpu.memory_space<vmem>>, %arg10: memref<8x1xf32, #tpu.memory_space<vmem>>) attributes {dimension_semantics = [#tpu.dimension_semantics<parallel>], iteration_bounds = array<i64: 1>, scalar_prefetch = 0 : i64, scratch_operands = 0 : i64, tpu.core_type = #tpu.core_type<tc>, window_params = [{transform_indices = @transform_0, window_bounds = array<i64: 8, 12>}, {transform_indices = @transform_1, window_bounds = array<i64: 8, 4>}, {pipeline_mode = #tpu.pipeline_mode<synchronous>, transform_indices = @transform_2, window_bounds = array<i64: 12, 32>}, {pipeline_mode = #tpu.pipeline_mode<synchronous>, transform_indices = @transform_3, window_bounds = array<i64: 4, 32>}, {pipeline_mode = #tpu.pipeline_mode<synchronous>, transform_indices = @transform_4, window_bounds = array<i64: 1, 32>}, {pipeline_mode = #tpu.pipeline_mode<synchronous>, transform_indices = @transform_5, window_bounds = array<i64: 32, 16>}, {pipeline_mode = #tpu.pipeline_mode<synchronous>, transform_indices = @transform_6, window_bounds = array<i64: 1, 16>}, {pipeline_mode = #tpu.pipeline_mode<synchronous>, transform_indices = @transform_7, window_bounds = array<i64: 1, 16>}, {pipeline_mode = #tpu.pipeline_mode<synchronous>, transform_indices = @transform_8, window_bounds = array<i64: 1, 1>}, {transform_indices = @transform_9, window_bounds = array<i64: 8, 1>}]} {
    %c0 = arith.constant 0 : index
    %c0_0 = arith.constant 0 : index
    %0 = vector.load %arg1[%c0, %c0_0] : memref<8x12xf32, #tpu.memory_space<vmem>>, vector<8x12xf32>
    %c0_1 = arith.constant 0 : index
    %c0_2 = arith.constant 0 : index
    %1 = vector.load %arg2[%c0_1, %c0_2] : memref<8x4xf32, #tpu.memory_space<vmem>>, vector<8x4xf32>
    %c0_3 = arith.constant 0 : index
    %c0_4 = arith.constant 0 : index
    %2 = vector.load %arg3[%c0_3, %c0_4] : memref<12x32xf32, #tpu.memory_space<vmem>>, vector<12x32xf32>
    %cst = arith.constant dense<0.000000e+00> : vector<8x32xf32>
    %3 = tpu.matmul %0, %2, %cst {dimension_numbers = #tpu.dot_dimension_numbers<[1], [0], [0], [1], [0, 0, 1, 1], [], []>} : vector<8x12xf32>, vector<12x32xf32>, vector<8x32xf32> -> vector<8x32xf32>
    %c0_5 = arith.constant 0 : index
    %c0_6 = arith.constant 0 : index
    %4 = vector.load %arg4[%c0_5, %c0_6] : memref<4x32xf32, #tpu.memory_space<vmem>>, vector<4x32xf32>
    %cst_7 = arith.constant dense<0.000000e+00> : vector<8x32xf32>
    %5 = tpu.matmul %1, %4, %cst_7 {dimension_numbers = #tpu.dot_dimension_numbers<[1], [0], [0], [1], [0, 0, 1, 1], [], []>} : vector<8x4xf32>, vector<4x32xf32>, vector<8x32xf32> -> vector<8x32xf32>
    %6 = arith.addf %3, %5 : vector<8x32xf32>
    %c0_8 = arith.constant 0 : index
    %c0_9 = arith.constant 0 : index
    %7 = vector.load %arg5[%c0_8, %c0_9] : memref<1x32xf32, #tpu.memory_space<vmem>>, vector<1x32xf32>
    %8 = vector.broadcast %7 : vector<1x32xf32> to vector<8x32xf32>
    %9 = arith.addf %6, %8 : vector<8x32xf32>
    %cst_10 = arith.constant 0.000000e+00 : f32
    %10 = vector.broadcast %cst_10 : f32 to vector<8x32xf32>
    %11 = arith.maximumf %9, %10 : vector<8x32xf32>
    %c0_11 = arith.constant 0 : index
    %c0_12 = arith.constant 0 : index
    %12 = vector.load %arg6[%c0_11, %c0_12] : memref<32x16xf32, #tpu.memory_space<vmem>>, vector<32x16xf32>
    %cst_13 = arith.constant dense<0.000000e+00> : vector<8x16xf32>
    %13 = tpu.matmul %11, %12, %cst_13 {dimension_numbers = #tpu.dot_dimension_numbers<[1], [0], [0], [1], [0, 0, 1, 1], [], []>} : vector<8x32xf32>, vector<32x16xf32>, vector<8x16xf32> -> vector<8x16xf32>
    %c0_14 = arith.constant 0 : index
    %c0_15 = arith.constant 0 : index
    %14 = vector.load %arg7[%c0_14, %c0_15] : memref<1x16xf32, #tpu.memory_space<vmem>>, vector<1x16xf32>
    %15 = vector.broadcast %14 : vector<1x16xf32> to vector<8x16xf32>
    %16 = arith.addf %13, %15 : vector<8x16xf32>
    %cst_16 = arith.constant 0.000000e+00 : f32
    %17 = vector.broadcast %cst_16 : f32 to vector<8x16xf32>
    %18 = arith.maximumf %16, %17 : vector<8x16xf32>
    %c0_17 = arith.constant 0 : index
    %c0_18 = arith.constant 0 : index
    %19 = vector.load %arg8[%c0_17, %c0_18] : memref<1x16xf32, #tpu.memory_space<vmem>>, vector<1x16xf32>
    %20 = vector.broadcast %19 : vector<1x16xf32> to vector<8x16xf32>
    %21 = arith.mulf %18, %20 : vector<8x16xf32>
    %cst_19 = arith.constant dense<0.000000e+00> : vector<8xf32>
    %22 = vector.multi_reduction <add>, %21, %cst_19 [1] : vector<8x16xf32> to vector<8xf32>
    %23 = vector.shape_cast %22 : vector<8xf32> to vector<8x1xf32>
    %c0_20 = arith.constant 0 : index
    %c0_21 = arith.constant 0 : index
    %24 = vector.load %arg9[%c0_20, %c0_21] : memref<1x1xf32, #tpu.memory_space<vmem>>, vector<1x1xf32>
    %25 = vector.broadcast %24 : vector<1x1xf32> to vector<8x1xf32>
    %26 = arith.addf %23, %25 : vector<8x1xf32>
    %cst_22 = arith.constant 0.000000e+00 : f32
    %27 = vector.broadcast %cst_22 : f32 to vector<8x1xf32>
    %28 = arith.maximumf %26, %27 : vector<8x1xf32>
    %29 = math.absf %26 : vector<8x1xf32>
    %cst_23 = arith.constant 0.000000e+00 : f32
    %30 = vector.broadcast %cst_23 : f32 to vector<8x1xf32>
    %31 = arith.subf %30, %29 : vector<8x1xf32>
    %32 = math.exp %31 : vector<8x1xf32>
    %33 = math.log1p %32 : vector<8x1xf32>
    %34 = arith.addf %28, %33 : vector<8x1xf32>
    %c0_24 = arith.constant 0 : index
    %c0_25 = arith.constant 0 : index
    %35 = vector.load %arg10[%c0_24, %c0_25] : memref<8x1xf32, #tpu.memory_space<vmem>>, vector<8x1xf32>
    tpu.vector_store %arg10[%c0_24, %c0_25], %34 {strides = array<i32>} : memref<8x1xf32, #tpu.memory_space<vmem>>, vector<8x1xf32>,
    return
  }
  func.func @transform_0(%arg0: i32) -> (i32, i32) {
    %c0_i32 = arith.constant 0 : i32
    %c0_i32_0 = arith.constant 0 : i32
    return %arg0, %c0_i32 : i32, i32
  }
  func.func @transform_1(%arg0: i32) -> (i32, i32) {
    %c0_i32 = arith.constant 0 : i32
    %c0_i32_0 = arith.constant 0 : i32
    return %arg0, %c0_i32 : i32, i32
  }
  func.func @transform_2(%arg0: i32) -> (i32, i32) {
    %c0_i32 = arith.constant 0 : i32
    %c0_i32_0 = arith.constant 0 : i32
    %c0_i32_1 = arith.constant 0 : i32
    return %c0_i32, %c0_i32_0 : i32, i32
  }
  func.func @transform_3(%arg0: i32) -> (i32, i32) {
    %c0_i32 = arith.constant 0 : i32
    %c0_i32_0 = arith.constant 0 : i32
    %c0_i32_1 = arith.constant 0 : i32
    return %c0_i32, %c0_i32_0 : i32, i32
  }
  func.func @transform_4(%arg0: i32) -> (i32, i32) {
    %c0_i32 = arith.constant 0 : i32
    %c0_i32_0 = arith.constant 0 : i32
    %c0_i32_1 = arith.constant 0 : i32
    return %c0_i32, %c0_i32_0 : i32, i32
  }
  func.func @transform_5(%arg0: i32) -> (i32, i32) {
    %c0_i32 = arith.constant 0 : i32
    %c0_i32_0 = arith.constant 0 : i32
    %c0_i32_1 = arith.constant 0 : i32
    return %c0_i32, %c0_i32_0 : i32, i32
  }
  func.func @transform_6(%arg0: i32) -> (i32, i32) {
    %c0_i32 = arith.constant 0 : i32
    %c0_i32_0 = arith.constant 0 : i32
    %c0_i32_1 = arith.constant 0 : i32
    return %c0_i32, %c0_i32_0 : i32, i32
  }
  func.func @transform_7(%arg0: i32) -> (i32, i32) {
    %c0_i32 = arith.constant 0 : i32
    %c0_i32_0 = arith.constant 0 : i32
    %c0_i32_1 = arith.constant 0 : i32
    return %c0_i32, %c0_i32_0 : i32, i32
  }
  func.func @transform_8(%arg0: i32) -> (i32, i32) {
    %c0_i32 = arith.constant 0 : i32
    %c0_i32_0 = arith.constant 0 : i32
    %c0_i32_1 = arith.constant 0 : i32
    return %c0_i32, %c0_i32_0 : i32, i32
  }
  func.func @transform_9(%arg0: i32) -> (i32, i32) {
    %c0_i32 = arith.constant 0 : i32
    %c0_i32_0 = arith.constant 0 : i32
    return %arg0, %c0_i32 : i32, i32
  }
}

</mosaic_0001>

<bundles_post_ra>
// kernel: tpu_custom_call.1
= control target key start
LH: loop header
LB: loop body
LE: loop exit
PB: predicated region body
PF: predicated region fallthrough
CT: control target
= control target key end

     0   :  { %vm43_vm0 = vcmask 1043456   ;;  %vm39_vm1 = vcmask 31744   ;;  %v378_v0 = vmov 0.0   ;;  %vm379_vm2 = vmmov 0   ;;  %s474_s3 = inlined_call_operand.vmem [shape: f32[4,32], index: 3, kind: input, shape index: {}]   ;;  %s475_s1 = inlined_call_operand.vmem [shape: f32[8,4], index: 1, kind: input, shape index: {}]   ;;  %s476_s2 = inlined_call_operand.vmem [shape: f32[12,32], index: 2, kind: input, shape index: {}]   ;;  %s477_s0 = inlined_call_operand.vmem [shape: f32[8,12], index: 0, kind: input, shape index: {}]   ;;  %s478_s5 = inlined_call_operand.vmem [shape: f32[32,16], index: 5, kind: input, shape index: {}]   ;;  %s479_s4 = inlined_call_operand.vmem [shape: f32[1,32], index: 4, kind: input, shape index: {}]   ;;  %s480_s8 = inlined_call_operand.<no memory space> [shape: f32[1,1], index: 8, kind: input, shape index: {}]   ;;  %s481_s6 = inlined_call_operand.vmem [shape: f32[1,16], index: 6, kind: input, shape index: {}]   ;;  %s482_s7 = inlined_call_operand.vmem [shape: f32[1,16], index: 7, kind: input, shape index: {}]   ;;  %s483_s9 = inlined_call_operand.vmem [shape: f32[8,1], index: 9, kind: output, shape index: {}]  }
   0x1   :  { %349 = vmatprep.subr.mxu1 %v378_v0  ;;  %v38_v1 = vld [vmem:[%s474_s3] sm:$0xf]  ;;  %351 = vmatprep.mubr.msk.f32.mxu1 %vm379_vm2, %v378_v0  ;;  %v37_v3 = vld [vmem:[%s476_s2 + $0x8] sm:$0xf]  ;;  %vm117_vm3 = vcmask 97280   ;;  %v206_v6 = vld [vmem:[%s478_s5 + $0x18] sm:$0xff]  ;;  %v14_v18 = vstv %s480_s8 }
   0x2   :  { %v35_v2 = vld [vmem:[%s475_s1] sm:$0xff]  ;;  %350 = vmatpush3.msk.msra.mxu1 %vm43_vm0, %v38_v1  ;;  %361 = vmatprep.subr.mxu0 %v378_v0  ;;  %v205_v7 = vld [vmem:[%s478_s5 + $0x10] sm:$0xff]  ;;  %v204_v8 = vld [vmem:[%s478_s5 + $0x8] sm:$0xff]  ;;  %vm214_vm4 = vcmask 261120   ;;  %15 = vst [vmem:[#allocation2] sm:$0x1] %v14_v18 }
   0x3   :  { %352 = vmatmul.mubr.msk.f32.vlgmr.msra.gmra.mxu1 %vm39_vm1, %v35_v2  ;;  %354 = vmatprep.subr.mxu1 %v378_v0  ;;  %v36_v4 = vld [vmem:[%s476_s2] sm:$0xff]  ;;  %vm297_vm5 = vcmask 130048   ;;  %vm324_vm7 = vcmask 7168  }
   0x4   :  { %355 = vmatpush3.msk.msra.mxu1 %vm43_vm0, %v37_v3  ;;  %358 = vmatprep.mubr.msk.f32.mxu1 %vm379_vm2, %v378_v0  ;;  %v34_v5 = vld [vmem:[%s477_s0] sm:$0xff] }
   0x5   :  { %356 = vmatprep.subr.mxu1 %v378_v0  ;;  %369 = vmatprep.mubr.msk.f32.mxu0 %vm379_vm2, %v378_v0  ;;  %v203_v9 = vld [vmem:[%s478_s5] sm:$0xff] }
   0x6   :  { %357 = vmatpush3.msra.mxu1 %v36_v4  ;;  %362 = vmatpush3.msra.mxu0 %v206_v6  ;;  %v334_v13 = vld [vmem:[%s479_s4] ss:$0 sm:$0xff] }
   0x7   :  { %359 = vmatmul.mubr.msk.f32.vlgmr.msra.gmra.mxu1 %vm117_vm3, %v34_v5  ;;  %363 = vmatprep.subr.mxu0 %v378_v0  ;;  %v335_v19 = vld [vmem:[%s481_s6] ss:$0 sm:$0xff] }
   0x8   :  { %364 = vmatpush3.msra.mxu0 %v205_v7  ;;  %v337_v23 = vld [vmem:[%s482_s7] ss:$0 sm:$0xff] }
   0x9   :  { %365 = vmatprep.subr.mxu0 %v378_v0  ;;  %v338_v27 = vld [vmem:[#allocation2] ss:$0 sm:$0xff] }
   0xa   :  { %366 = vmatpush3.msra.mxu0 %v204_v8 }
   0xb   :  { %367 = vmatprep.subr.mxu0 %v378_v0 }
   0xc   :  { %368 = vmatpush3.msra.mxu0 %v203_v9 }
  0xc3   :  { %v113_v10 = vpop.f32.mrf.mxu1 }
  0xc5   :  { %v353_v11 = vpop.f32.mrf.mxu1 }
  0xc7   :  { %v190_v12 = vpop.f32.mrf.mxu1 }
  0xc8   :  { %v191_v14 = vadd.f32 %v190_v12, %v113_v10 }
  0xc9   :  { %v360_v15 = vpop.f32.mrf.mxu1 }
  0xca   :  { %v201_v16 = vadd.f32 %v334_v13, %v191_v14 }
  0xcc   :  { %v202_v17 = vmax.f32 %v201_v16, 0.0 }
  0xce   :  { %370 = vmatmul.mubr.msk.f32.vlgmr.msra.gmra.mxu0 %vm214_vm4, %v202_v17 }
 0x18e   :  { %v284_v20 = vpop.f32.mrf.mxu0 }
 0x18f   :  { %v285_v21 = vadd.f32 %v335_v19, %v284_v20 }
 0x190   :  { %v371_v22 = vpop.f32.mrf.mxu0 }
 0x191   :  { %v288_v24 = vmax.f32 %v285_v21, 0.0 }
 0x193   :  { %v296_v25 = vmul.f32 %v337_v23, %v288_v24 }
 0x195   :  { %v298_v26 = vsel %vm297_vm5, %v296_v25, 0.0 }
 0x196   :  { %299 = vadd.xlane.f32.xlu0 %v298_v26 }
 0x21f   :  { %v300_v28 = vpop.xlane.xlu0 %299 }
 0x220   :  { %v308_v29 = vadd.f32 %v338_v27, %v300_v28 }
 0x222   :  { %v310_v30 = vand.u32 2147483647, %v308_v29  ;;  %v309_v41 = vmax.f32 %v308_v29, 0.0 }
 0x224   :  { %v311_v31 = vsub.f32 0.0, %v310_v30 }
 0x226   :  { %v312_v32 = vmul.f32 1.442695, %v311_v31 }
 0x228   :  { %374 = vpow2.f32 %v312_v32 }
 0x235   :  { %v375_v33 = vpop.eup %374 }
 0x236   :  { %v314_v34 = vadd.f32 1.0, %v375_v33  ;;  %v317_v35 = vmul.f32 -0.5, %v375_v33  ;;  %v320_v37 = vand.u32 2147483647, %v375_v33 }
 0x238   :  { %376 = vlog2.f32 %v314_v34  ;;  %v318_v36 = vadd.f32 1.0, %v317_v35  ;;  %vm321_vm6 = vcmp.lt.f32.partialorder %v320_v37, 0.0004427343 }
 0x23a   :  { %v319_v40 = vmul.f32 %v375_v33, %v318_v36 }
 0x245   :  { %v377_v38 = vpop.eup %376 }
 0x246   :  { %v316_v39 = vmul.f32 0.6931472, %v377_v38 }
 0x248   :  { %v322_v42 = vsel %vm321_vm6, %v319_v40, %v316_v39 }
 0x249   :  { %v323_v43 = vadd.f32 %v322_v42, %v309_v41 }
 0x24b   :  { %325 = vst.msk [vmem:[%s483_s9] sm:$0xff] %vm324_vm7, %v323_v43 }

</bundles_post_ra>
